<compile_context>
chip_gen: v5e
topology: v5e:2x2
jax: 0.10.0
libtpu: 0.0.40
codegen_flags: <defaults>
</compile_context>

<pallas_src>
import jax
import jax.numpy as jnp
from jax.experimental import pallas as pl
from jax.experimental.pallas import tpu as pltpu


def _cls_head_kernel(x_ref, w_ref, b_ref, out_ref):
    """x_ref: (TB, H) CLS rows; w_ref: (H, LP); b_ref: (1, LP) f32; out_ref: (TB, LP)."""
    # Cast to the weight/compute dtype on the VPU (no-op if dtypes already match).
    x = x_ref[...].astype(w_ref.dtype)
    # MXU matmul with f32 accumulation.
    logits = jnp.dot(x, w_ref[...], preferred_element_type=jnp.float32)   # (TB, LP) f32
    # Bias add in f32 on the VPU (v5e has no bf16 VPU), then cast to output dtype.
    out_ref[...] = (logits + b_ref[...]).astype(out_ref.dtype)


def prepare_classifier_params(weight, bias, compute_dtype=jnp.bfloat16):
    """One-time prep (cache the result): transpose to (H, L), pad L to 128 lanes.

    weight: (L, H)   bias: (L,)   ->   w_p: (H, LP) compute_dtype, b_p: (1, LP) f32
    bf16 compute_dtype is recommended on v5e, v6e and v7x (HBM-bound kernel,
    native bf16 MXU everywhere); accumulation/bias stay f32.
    """
    L, H = weight.shape
    LP = ((L + 127) // 128) * 128                      # lane-dense output width (no over-pad)
    w_p = jnp.zeros((H, LP), compute_dtype).at[:, :L].set(weight.T.astype(compute_dtype))
    b_p = jnp.zeros((1, LP), jnp.float32).at[:, :L].set(bias.reshape(1, L).astype(jnp.float32))
    return w_p, b_p


def _pick_batch_tile(B, H, x_itemsize, batch_tile):
    """Batch tile: multiple of 16 (bf16 packing), <= B, >= 2 grid steps when possible,
    double-buffered input block <= ~16 MiB (v7x scoped-VMEM safe)."""
    if B < 8:
        return B                                       # block == full dim: always legal
    sub = 16 if B >= 16 else 8
    tb = min(batch_tile, (B // sub) * sub)             # largest sub-multiple <= B (no padding)
    half = ((pl.cdiv(B, 2) + sub - 1) // sub) * sub    # aim for >= 2 steps (v7x: 2 TensorCores)
    tb = min(tb, max(half, sub))
    vmem_budget = 16 * 1024 * 1024
    max_tb = max(sub, (vmem_budget // (2 * H * x_itemsize)) // sub * sub)
    return max(sub, min(tb, max_tb))


def ne_classifier_forward(hidden_states, w_padded, b_padded, n_labels,
                          batch_tile=512, out_dtype=jnp.float32):
    """hidden_states: (B, S, H); w_padded: (H, LP); b_padded: (1, LP) -> (B, n_labels)."""
    B, S, H = hidden_states.shape
    assert w_padded.shape[0] == H, "weight hidden dim must match hidden_states"
    LP = w_padded.shape[1]

    # torch.stack(hidden_states[-1:], 0).sum(0) with n=1 is the identity.
    # Dropout(p=0.2) is identity at inference time.
    # TODO(synk): training-mode dropout (stochastic mask) not implemented.

    x_itemsize = jnp.dtype(hidden_states.dtype).itemsize
    tb = _pick_batch_tile(B, H, x_itemsize, batch_tile)
    nb = pl.cdiv(B, tb)                                # ragged last block is masked by Pallas

    flops = 2 * B * H * LP
    bytes_accessed = (B * H * x_itemsize
                      + H * LP * jnp.dtype(w_padded.dtype).itemsize
                      + B * LP * jnp.dtype(out_dtype).itemsize)

    def call(x_operand, x_spec):
        return pl.pallas_call(
            _cls_head_kernel,
            out_shape=jax.ShapeDtypeStruct((B, LP), out_dtype),
            grid_spec=pltpu.PrefetchScalarGridSpec(
                num_scalar_prefetch=0,
                grid=(nb,),
                in_specs=[
                    x_spec,                                        # CLS rows, pipelined
                    pl.BlockSpec((H, LP), lambda i: (0, 0)),       # weight, grid-invariant
                    pl.BlockSpec((1, LP), lambda i: (0, 0)),       # bias, grid-invariant
                ],
                out_specs=pl.BlockSpec((tb, LP), lambda i: (i, 0)),  # lane-dense store
            ),
            compiler_params=pltpu.CompilerParams(
                dimension_semantics=("parallel",),                 # 2-TC sharding on v7x
            ),
            cost_estimate=pl.CostEstimate(flops=flops, transcendentals=0,
                                          bytes_accessed=bytes_accessed),
        )(x_operand, w_padded, b_padded)

    try:
        # Fused CLS gather: S dim squeezed in the BlockSpec, index_map picks token 0.
        # The input DMA reads only row 0 of each sequence (HBM row stride S*H),
        # so activation traffic is B*H instead of B*S*H and there is no wrapper
        # slice/cast roundtrip.
        out = call(hidden_states, pl.BlockSpec((tb, None, H), lambda i: (i, 0, 0)))
        out = jax.block_until_ready(out)
    except Exception:
        # Fallback for Pallas builds that reject squeezing a non-leading block dim:
        # pre-slice the CLS rows (costs one extra B*H HBM roundtrip).
        out = call(hidden_states[:, 0, :], pl.BlockSpec((tb, H), lambda i: (i, 0)))
        out = jax.block_until_ready(out)

    return out[:, :n_labels]


if __name__ == "__main__":
    # Small, forward-consistent shapes:
    #   batch B=2, seq S=8, transformer hidden H=32, n_predicates_labels L=8
    B, S, H, L = 2, 8, 32, 8

    key = jax.random.PRNGKey(0)
    k_hid, k_w, k_b = jax.random.split(key, 3)

    # Synthetic transformer last-layer hidden states (stand-in for AutoModel).
    hidden_states = jax.random.normal(k_hid, (B, S, H), dtype=jnp.float32)

    # Deterministic nn.Linear(H, L) init (PyTorch default: U(-1/sqrt(H), 1/sqrt(H))).
    bound = 1.0 / jnp.sqrt(jnp.float32(H))
    weight = jax.random.uniform(k_w, (L, H), jnp.float32, -bound, bound)
    bias = jax.random.uniform(k_b, (L,), jnp.float32, -bound, bound)

    # --- f32 path (tight check) ----------------------------------------------
    w32, b32 = prepare_classifier_params(weight, bias, compute_dtype=jnp.float32)
    preds_f32 = jax.block_until_ready(ne_classifier_forward(hidden_states, w32, b32, L))
    ref_f32 = hidden_states[:, 0, :] @ weight.T + bias
    assert preds_f32.shape == (B, L)
    assert jnp.allclose(preds_f32, ref_f32, atol=1e-4, rtol=1e-4)

    # --- bf16 path (all generations: halved DMA bytes, f32 accumulation) ------
    wbf, bbf = prepare_classifier_params(weight, bias, compute_dtype=jnp.bfloat16)
    preds_bf16 = jax.block_until_ready(ne_classifier_forward(hidden_states, wbf, bbf, L))
    cls_rt = hidden_states[:, 0, :].astype(jnp.bfloat16).astype(jnp.float32)
    w_rt = weight.astype(jnp.bfloat16).astype(jnp.float32)
    ref_bf16 = cls_rt @ w_rt.T + bias
    assert preds_bf16.shape == (B, L)
    assert jnp.allclose(preds_bf16, ref_bf16, atol=1e-2, rtol=1e-2)

    # --- ragged multi-step grid check (exercises the no-pad path) -------------
    B2, S2, H2, L2 = 100, 8, 128, 10
    k2h, k2w, k2b = jax.random.split(jax.random.PRNGKey(0), 3)
    hid2 = jax.random.normal(k2h, (B2, S2, H2), dtype=jnp.float32)
    bnd2 = 1.0 / jnp.sqrt(jnp.float32(H2))
    w2 = jax.random.uniform(k2w, (L2, H2), jnp.float32, -bnd2, bnd2)
    b2 = jax.random.uniform(k2b, (L2,), jnp.float32, -bnd2, bnd2)
    w2p, b2p = prepare_classifier_params(w2, b2, compute_dtype=jnp.float32)
    preds2 = jax.block_until_ready(ne_classifier_forward(hid2, w2p, b2p, L2))
    ref2 = hid2[:, 0, :] @ w2.T + b2
    assert preds2.shape == (B2, L2)
    assert jnp.allclose(preds2, ref2, atol=1e-4, rtol=1e-4)

    print("KERNEL_OK")
</pallas_src>

<mosaic_0001>
module attributes {stable_mosaic.version = 11 : i64} {
  func.func @_cls_head_kernel(%arg0: i32, %arg1: memref<2x32xf32, #tpu.memory_space<vmem>>, %arg2: memref<32x128xf32, #tpu.memory_space<vmem>>, %arg3: memref<1x128xf32, #tpu.memory_space<vmem>>, %arg4: memref<2x128xf32, #tpu.memory_space<vmem>>) attributes {dimension_semantics = [#tpu.dimension_semantics<parallel>], iteration_bounds = array<i64: 1>, scalar_prefetch = 0 : i64, scratch_operands = 0 : i64, tpu.core_type = #tpu.core_type<tc>, window_params = [{transform_indices = @transform_0, window_bounds = array<i64: 2, 32>}, {pipeline_mode = #tpu.pipeline_mode<synchronous>, transform_indices = @transform_1, window_bounds = array<i64: 32, 128>}, {pipeline_mode = #tpu.pipeline_mode<synchronous>, transform_indices = @transform_2, window_bounds = array<i64: 1, 128>}, {transform_indices = @transform_3, window_bounds = array<i64: 2, 128>}]} {
    %c0 = arith.constant 0 : index
    %c0_0 = arith.constant 0 : index
    %0 = vector.load %arg1[%c0, %c0_0] : memref<2x32xf32, #tpu.memory_space<vmem>>, vector<2x32xf32>
    %c0_1 = arith.constant 0 : index
    %c0_2 = arith.constant 0 : index
    %1 = vector.load %arg2[%c0_1, %c0_2] : memref<32x128xf32, #tpu.memory_space<vmem>>, vector<32x128xf32>
    %cst = arith.constant dense<0.000000e+00> : vector<2x128xf32>
    %2 = tpu.matmul %0, %1, %cst {dimension_numbers = #tpu.dot_dimension_numbers<[1], [0], [0], [1], [0, 0, 1, 1], [], []>} : vector<2x32xf32>, vector<32x128xf32>, vector<2x128xf32> -> vector<2x128xf32>
    %c0_3 = arith.constant 0 : index
    %c0_4 = arith.constant 0 : index
    %3 = vector.load %arg3[%c0_3, %c0_4] : memref<1x128xf32, #tpu.memory_space<vmem>>, vector<1x128xf32>
    %4 = vector.broadcast %3 : vector<1x128xf32> to vector<2x128xf32>
    %5 = arith.addf %2, %4 : vector<2x128xf32>
    %c0_5 = arith.constant 0 : index
    %c0_6 = arith.constant 0 : index
    %6 = vector.load %arg4[%c0_5, %c0_6] : memref<2x128xf32, #tpu.memory_space<vmem>>, vector<2x128xf32>
    tpu.vector_store %arg4[%c0_5, %c0_6], %5 {strides = array<i32>} : memref<2x128xf32, #tpu.memory_space<vmem>>, vector<2x128xf32>,
    return
  }
  func.func @transform_0(%arg0: i32) -> (i32, i32) {
    %c0_i32 = arith.constant 0 : i32
    %c0_i32_0 = arith.constant 0 : i32
    return %arg0, %c0_i32 : i32, i32
  }
  func.func @transform_1(%arg0: i32) -> (i32, i32) {
    %c0_i32 = arith.constant 0 : i32
    %c0_i32_0 = arith.constant 0 : i32
    %c0_i32_1 = arith.constant 0 : i32
    return %c0_i32, %c0_i32_0 : i32, i32
  }
  func.func @transform_2(%arg0: i32) -> (i32, i32) {
    %c0_i32 = arith.constant 0 : i32
    %c0_i32_0 = arith.constant 0 : i32
    %c0_i32_1 = arith.constant 0 : i32
    return %c0_i32, %c0_i32_0 : i32, i32
  }
  func.func @transform_3(%arg0: i32) -> (i32, i32) {
    %c0_i32 = arith.constant 0 : i32
    %c0_i32_0 = arith.constant 0 : i32
    return %arg0, %c0_i32 : i32, i32
  }
}

</mosaic_0001>

<bundles_post_ra>
// kernel: tpu_custom_call.1
= control target key start
LH: loop header
LB: loop body
LE: loop exit
PB: predicated region body
PF: predicated region fallthrough
CT: control target
= control target key end

     0   :  { %8 = vsyncpa [#allocation3], 0  ;;  %s219_s0 = inlined_call_operand.hbm [shape: f32[2,32], index: 0, kind: input, shape index: {}]   ;;  %s220_s1 = inlined_call_operand.hbm [shape: f32[32,128], index: 1, kind: input, shape index: {}]   ;;  %s221_s2 = inlined_call_operand.vmem [shape: f32[1,128], index: 2, kind: input, shape index: {}]   ;;  %s222_s3 = inlined_call_operand.hbm [shape: f32[2,128], index: 3, kind: output, shape index: {}]  }
   0x1   :  { %9 = vsyncpa [#allocation6], 0 }
   0x2   :  { %10 = vsyncpa [#allocation4], 0  ;;  %s16_s14 = sshll.u32 %s219_s0, 4  ;;  %s182_s15 = smov [#allocation2]   ;;  %s17_s14 = int_to_ptr.hbm [resolvable:$true] %s16_s14 }
   0x3   :  { %s18_s16 = sshll.u32 %s182_s15, 4  ;;  %s26_s19 = sshll.u32 %s220_s1, 4  ;;  %s19_s16 = int_to_ptr.vmem [resolvable:$true] %s18_s16  ;;  %s27_s19 = int_to_ptr.hbm [resolvable:$true] %s26_s19 }
   0x4   :  { %21 = dma.hbm_to_vmem [thread:$0]  %s17_s14, 32, %s19_s16, [#allocation3]  }
   0x5   :  { %s183_s20 = smov [#allocation5]   ;;  %s184_s22 = smov 128  }
   0x6   :  { %s28_s21 = sshll.u32 %s183_s20, 4  ;;  %s185_s23 = smov 8   ;;  %s29_s21 = int_to_ptr.vmem [resolvable:$true] %s28_s21 }
   0x7   :  { %34 = dma.hbm_to_vmem [thread:$0]  %s27_s19, 512, %s29_s21, [#allocation6], %s184_s22, %s184_s22, %s185_s23  }
   0x8   :  { %176 = dma.done.wait [#allocation3], 32  }
   0x9   :  { %177 = vsyncadd [#allocation3], 4294967264 }
   0xa   :  { %178 = dma.done.wait [#allocation6], 512  }
   0xb   :  { %179 = vsyncadd [#allocation6], 4294966784  ;;  %v49_v0 = vld [vmem:[#allocation5 + $0x18] sm:$0xff]  ;;  %v48_v1 = vld [vmem:[#allocation5 + $0x10] sm:$0xff]  ;;  %vm54_vm0 = vcmask 261120   ;;  %s186_s24 = smov [#allocation7]  }
   0xc   :  { %70 = vmatpush.msra.mxu0 %v49_v0  ;;  %v47_v2 = vld [vmem:[#allocation5 + $0x8] sm:$0xff]  ;;  %v46_v3 = vld [vmem:[#allocation5] sm:$0xff]  ;;  %v45_v4 = vld [vmem:[#allocation2] sm:$0x3]  ;;  %s84_s25 = sshll.u32 %s186_s24, 4  ;;  %s86_s28 = sshll.u32 %s222_s3, 4  ;;  %s85_s25 = int_to_ptr.vmem [resolvable:$true] %s84_s25  ;;  %s87_s28 = int_to_ptr.hbm [resolvable:$true] %s86_s28 }
   0xd   :  { %v103_v5 = vld [vmem:[%s221_s2] ss:$0 sm:$0xff] }
   0xe   :  { %71 = vmatpush.msra.mxu0 %v48_v1 }
  0x10   :  { %72 = vmatpush.msra.mxu0 %v47_v2 }
  0x12   :  { %73 = vmatpush.msra.mxu0 %v46_v3 }
  0x13   :  { %97 = vmatmul.msk.f32.vlgmr.msra.gmra.mxu0 %vm54_vm0, %v45_v4 }
  0x90   :  { %v75_v6 = vpop.f32.mrf.mxu0 }
  0x91   :  { %v76_v7 = vadd.f32 %v103_v5, %v75_v6 }
  0x93   :  { %78 = vst [vmem:[#allocation7] sm:$0x3] %v76_v7 }
  0x94   :  { %89 = dma.vmem_to_hbm [thread:$0]  %s85_s25, 32, %s87_s28, [#allocation4]  }
  0x95   :  { %180 = dma.done.wait [#allocation4], 32  }
  0x96   :  { %181 = vsyncadd [#allocation4], 4294967264 }
  0x97   :  { %94 = vsyncpa [#allocation3], 1 }
  0x98   :  { %95 = vsyncpa [#allocation6], 1 }
  0x99   :  { %96 = vsyncpa [#allocation4], 1 }

</bundles_post_ra>
